<compile_context>
chip_gen: v7x
topology: tpu7x:2x2x1
jax: 0.10.0
libtpu: 0.0.40
codegen_flags: <defaults>
</compile_context>

<pallas_src>
import jax
import jax.numpy as jnp
from jax.experimental import pallas as pl
from jax.experimental.pallas import tpu as pltpu

K_IN = 28 * 28          # 784 — used as a full-K block, no padding needed
N_HID = 128
N_OUT = 10
N_PAD = 128             # lane-dense padded output width (wrapper slices [:, :10])

_SUBLANE = 16           # batch-tile granularity: multiple of 16 covers f32 (8) and bf16 (16)
_MEGACORE_MIN = 512     # only split a single-tile batch in two if each half has >= this many rows


def mlp_kernel(x_ref, w1_ref, b1_ref, w2_ref, b2_ref, o_ref):
    # x_ref : (TB, 784)  f32  — cast to bf16 in-kernel (VPU work, hidden under the DMAs)
    # w1_ref: (784, 128) bf16, b1_ref: (1, 128) f32   (resident in VMEM)
    # w2_ref: (128, 128) bf16, b2_ref: (1, 128) f32   (resident in VMEM)
    # o_ref : (TB, 128)  bf16 — lane-dense writeback
    x = x_ref[...].astype(jnp.bfloat16)
    # First matmul on the MXU (bf16 x bf16 -> f32 accumulation); bias + ReLU in f32 (VPU).
    h = jnp.dot(x, w1_ref[...], preferred_element_type=jnp.float32) + b1_ref[...]
    h = jnp.maximum(h, 0.0)
    # Second matmul; accumulate f32, store bf16.
    o_ref[...] = (
        jnp.dot(h.astype(jnp.bfloat16), w2_ref[...],
                preferred_element_type=jnp.float32)
        + b2_ref[...]
    ).astype(o_ref.dtype)


def _round_up(n, m):
    return ((n + m - 1) // m) * m


def _choose_batch_tile(b, max_tile):
    """Pick a sublane-aligned batch tile that (a) caps per-buffer VMEM, (b) minimizes batch
    padding for awkward B, and (c) leaves >= 2 grid steps for megacore when B is large."""
    max_tile = max(_SUBLANE, (max_tile // _SUBLANE) * _SUBLANE)
    bpad = _round_up(b, _SUBLANE)
    if bpad <= max_tile:
        if bpad < 2 * _MEGACORE_MIN:
            return bpad                                   # one full-array block
        # Split in two so the ("parallel",) grid axis can shard across v7x's 2 TensorCores.
        return _round_up((bpad + 1) // 2, _SUBLANE)
    # Large batch: largest tile <= max_tile with minimal padding waste.
    best_tb, best_waste = _SUBLANE, None
    for tb in range(max_tile, _SUBLANE - 1, -_SUBLANE):
        waste = _round_up(bpad, tb) - bpad
        if best_waste is None or waste < best_waste:
            best_tb, best_waste = tb, waste
            if waste == 0:
                break
    return best_tb


def prepare_params(w1, b1, w2, b2):
    """One-time prep outside the hot path: transpose to [in, out], pad outputs, cast to bf16."""
    w1_t = w1.T.astype(jnp.bfloat16)                                        # (784, 128)
    w2_t = jnp.zeros((N_HID, N_PAD), jnp.float32).at[:, :N_OUT].set(w2.T)   # (128, 128)
    w2_t = w2_t.astype(jnp.bfloat16)
    b1_2d = b1.reshape(1, N_HID).astype(jnp.float32)
    b2_2d = jnp.zeros((1, N_PAD), jnp.float32).at[0, :N_OUT].set(b2)
    return w1_t, b1_2d, w2_t, b2_2d


def net_forward(x, w1_t, b1_2d, w2_t, b2_2d, *, batch_tile=2048):
    """x: (B, 1, 28, 28) float32 (NCHW).  Returns logits (B, 10) bfloat16.

    Logits come back in bf16 (f32 accumulation inside the kernel); downstream consumers
    (softmax / loss / argmax) can read them directly, or keep the padded (bp, 128) slab and
    fuse the [:, :10] slice into their own op to avoid an extra HBM pass.
    """
    B = x.shape[0]
    x2d = x.reshape(B, -1)                       # nn.Flatten — stays f32, no cast, no K-pad

    tb = _choose_batch_tile(B, batch_tile)
    bp = _round_up(B, tb)
    if bp != B:
        # Zero-pad only the (usually tiny, thanks to adaptive tb) ragged batch remainder.
        x2d = jnp.pad(x2d, ((0, bp - B), (0, 0)))

    grid = (bp // tb,)
    out = pl.pallas_call(
        mlp_kernel,
        out_shape=jax.ShapeDtypeStruct((bp, N_PAD), jnp.bfloat16),
        grid_spec=pltpu.PrefetchScalarGridSpec(
            num_scalar_prefetch=0,
            grid=grid,
            in_specs=[
                pl.BlockSpec((tb, K_IN), lambda i: (i, 0)),      # x: batch-tiled, full-K f32
                pl.BlockSpec((K_IN, N_HID), lambda i: (0, 0)),   # w1: resident
                pl.BlockSpec((1, N_HID), lambda i: (0, 0)),      # b1: resident
                pl.BlockSpec((N_HID, N_PAD), lambda i: (0, 0)),  # w2: resident
                pl.BlockSpec((1, N_PAD), lambda i: (0, 0)),      # b2: resident
            ],
            out_specs=pl.BlockSpec((tb, N_PAD), lambda i: (i, 0)),
        ),
        compiler_params=pltpu.CompilerParams(
            dimension_semantics=("parallel",),       # megacore sharding of the batch grid (v7x)
            vmem_limit_bytes=48 * 1024 * 1024,       # headroom for f32 x tiles at tb=2048-4096
        ),
    )(x2d, w1_t, b1_2d, w2_t, b2_2d)

    return out[:B, :N_OUT]


def init_params(key):
    """Deterministic params matching nn.Linear shapes: W1 (128, 784), W2 (10, 128)."""
    k1, k2, k3, k4 = jax.random.split(key, 4)
    lim1 = 1.0 / jnp.sqrt(784.0)
    lim2 = 1.0 / jnp.sqrt(128.0)
    w1 = jax.random.uniform(k1, (128, 784), jnp.float32, -lim1, lim1)
    b1 = jax.random.uniform(k2, (128,), jnp.float32, -lim1, lim1)
    w2 = jax.random.uniform(k3, (10, 128), jnp.float32, -lim2, lim2)
    b2 = jax.random.uniform(k4, (10,), jnp.float32, -lim2, lim2)
    return w1, b1, w2, b2


if __name__ == "__main__":
    key = jax.random.PRNGKey(0)
    kx, kp = jax.random.split(key)
    B = 2
    x = jax.random.normal(kx, (B, 1, 28, 28), jnp.float32)   # NCHW, MNIST-shaped
    w1, b1, w2, b2 = init_params(kp)

    # One-time param prep (transpose/pad/cast) outside the per-call hot path.
    w1_t, b1_2d, w2_t, b2_2d = prepare_params(w1, b1, w2, b2)

    logits = net_forward(x, w1_t, b1_2d, w2_t, b2_2d)
    logits = jax.block_until_ready(logits)

    # Reference check in plain JAX f32 (same math as the PyTorch forward).
    # Tolerance loosened because activations/weights/output are bf16 inside the kernel.
    x2d = x.reshape(B, -1)
    ref = jnp.maximum(x2d @ w1.T + b1, 0.0) @ w2.T + b2
    assert logits.shape == (B, 10)
    assert jnp.allclose(logits.astype(jnp.float32), ref, atol=5e-2, rtol=5e-2), (
        jnp.max(jnp.abs(logits.astype(jnp.float32) - ref)))

    print("KERNEL_OK")
</pallas_src>

<mosaic_0001>
module attributes {stable_mosaic.version = 11 : i64} {
  func.func @mlp_kernel(%arg0: i32, %arg1: memref<16x784xf32, #tpu.memory_space<vmem>>, %arg2: memref<784x128xbf16, #tpu.memory_space<vmem>>, %arg3: memref<1x128xf32, #tpu.memory_space<vmem>>, %arg4: memref<128x128xbf16, #tpu.memory_space<vmem>>, %arg5: memref<1x128xf32, #tpu.memory_space<vmem>>, %arg6: memref<16x128xbf16, #tpu.memory_space<vmem>>) attributes {dimension_semantics = [#tpu.dimension_semantics<parallel>], iteration_bounds = array<i64: 1>, scalar_prefetch = 0 : i64, scratch_operands = 0 : i64, tpu.core_type = #tpu.core_type<tc>, window_params = [{transform_indices = @transform_0, window_bounds = array<i64: 16, 784>}, {pipeline_mode = #tpu.pipeline_mode<synchronous>, transform_indices = @transform_1, window_bounds = array<i64: 784, 128>}, {pipeline_mode = #tpu.pipeline_mode<synchronous>, transform_indices = @transform_2, window_bounds = array<i64: 1, 128>}, {pipeline_mode = #tpu.pipeline_mode<synchronous>, transform_indices = @transform_3, window_bounds = array<i64: 128, 128>}, {pipeline_mode = #tpu.pipeline_mode<synchronous>, transform_indices = @transform_4, window_bounds = array<i64: 1, 128>}, {transform_indices = @transform_5, window_bounds = array<i64: 16, 128>}]} {
    %c0 = arith.constant 0 : index
    %c0_0 = arith.constant 0 : index
    %0 = vector.load %arg1[%c0, %c0_0] : memref<16x784xf32, #tpu.memory_space<vmem>>, vector<16x784xf32>
    %1 = arith.truncf %0 : vector<16x784xf32> to vector<16x784xbf16>
    %c0_1 = arith.constant 0 : index
    %c0_2 = arith.constant 0 : index
    %2 = vector.load %arg2[%c0_1, %c0_2] : memref<784x128xbf16, #tpu.memory_space<vmem>>, vector<784x128xbf16>
    %cst = arith.constant dense<0.000000e+00> : vector<16x128xf32>
    %3 = tpu.matmul %1, %2, %cst {dimension_numbers = #tpu.dot_dimension_numbers<[1], [0], [0], [1], [0, 0, 1, 1], [], []>} : vector<16x784xbf16>, vector<784x128xbf16>, vector<16x128xf32> -> vector<16x128xf32>
    %c0_3 = arith.constant 0 : index
    %c0_4 = arith.constant 0 : index
    %4 = vector.load %arg3[%c0_3, %c0_4] : memref<1x128xf32, #tpu.memory_space<vmem>>, vector<1x128xf32>
    %5 = vector.broadcast %4 : vector<1x128xf32> to vector<16x128xf32>
    %6 = arith.addf %3, %5 : vector<16x128xf32>
    %cst_5 = arith.constant 0.000000e+00 : f32
    %7 = vector.broadcast %cst_5 : f32 to vector<16x128xf32>
    %8 = arith.maximumf %6, %7 : vector<16x128xf32>
    %9 = arith.truncf %8 : vector<16x128xf32> to vector<16x128xbf16>
    %c0_6 = arith.constant 0 : index
    %c0_7 = arith.constant 0 : index
    %10 = vector.load %arg4[%c0_6, %c0_7] : memref<128x128xbf16, #tpu.memory_space<vmem>>, vector<128x128xbf16>
    %cst_8 = arith.constant dense<0.000000e+00> : vector<16x128xf32>
    %11 = tpu.matmul %9, %10, %cst_8 {dimension_numbers = #tpu.dot_dimension_numbers<[1], [0], [0], [1], [0, 0, 1, 1], [], []>} : vector<16x128xbf16>, vector<128x128xbf16>, vector<16x128xf32> -> vector<16x128xf32>
    %c0_9 = arith.constant 0 : index
    %c0_10 = arith.constant 0 : index
    %12 = vector.load %arg5[%c0_9, %c0_10] : memref<1x128xf32, #tpu.memory_space<vmem>>, vector<1x128xf32>
    %13 = vector.broadcast %12 : vector<1x128xf32> to vector<16x128xf32>
    %14 = arith.addf %11, %13 : vector<16x128xf32>
    %15 = arith.truncf %14 : vector<16x128xf32> to vector<16x128xbf16>
    %c0_11 = arith.constant 0 : index
    %c0_12 = arith.constant 0 : index
    %16 = vector.load %arg6[%c0_11, %c0_12] : memref<16x128xbf16, #tpu.memory_space<vmem>>, vector<16x128xbf16>
    tpu.vector_store %arg6[%c0_11, %c0_12], %15 {strides = array<i32>} : memref<16x128xbf16, #tpu.memory_space<vmem>>, vector<16x128xbf16>,
    return
  }
  func.func @transform_0(%arg0: i32) -> (i32, i32) {
    %c0_i32 = arith.constant 0 : i32
    %c0_i32_0 = arith.constant 0 : i32
    return %arg0, %c0_i32 : i32, i32
  }
  func.func @transform_1(%arg0: i32) -> (i32, i32) {
    %c0_i32 = arith.constant 0 : i32
    %c0_i32_0 = arith.constant 0 : i32
    %c0_i32_1 = arith.constant 0 : i32
    return %c0_i32, %c0_i32_0 : i32, i32
  }
  func.func @transform_2(%arg0: i32) -> (i32, i32) {
    %c0_i32 = arith.constant 0 : i32
    %c0_i32_0 = arith.constant 0 : i32
    %c0_i32_1 = arith.constant 0 : i32
    return %c0_i32, %c0_i32_0 : i32, i32
  }
  func.func @transform_3(%arg0: i32) -> (i32, i32) {
    %c0_i32 = arith.constant 0 : i32
    %c0_i32_0 = arith.constant 0 : i32
    %c0_i32_1 = arith.constant 0 : i32
    return %c0_i32, %c0_i32_0 : i32, i32
  }
  func.func @transform_4(%arg0: i32) -> (i32, i32) {
    %c0_i32 = arith.constant 0 : i32
    %c0_i32_0 = arith.constant 0 : i32
    %c0_i32_1 = arith.constant 0 : i32
    return %c0_i32, %c0_i32_0 : i32, i32
  }
  func.func @transform_5(%arg0: i32) -> (i32, i32) {
    %c0_i32 = arith.constant 0 : i32
    %c0_i32_0 = arith.constant 0 : i32
    return %arg0, %c0_i32 : i32, i32
  }
}

</mosaic_0001>

<bundles_post_ra>
// kernel: tpu_custom_call.1
= control target key start
LH: loop header
LB: loop body
LE: loop exit
PB: predicated region body
PF: predicated region fallthrough
CT: control target
= control target key end

     0   :  { %10 = vsyncpa [#allocation3], 0  ;;  %s1243_s0 = inlined_call_operand.hbm [shape: f32[16,784], index: 0, kind: input, shape index: {}]   ;;  %s1244_s1 = inlined_call_operand.hbm [shape: bf16[784,128], index: 1, kind: input, shape index: {}]   ;;  %s1245_s2 = inlined_call_operand.vmem [shape: f32[1,128], index: 2, kind: input, shape index: {}]   ;;  %s1246_s3 = inlined_call_operand.hbm [shape: bf16[128,128], index: 3, kind: input, shape index: {}]   ;;  %s1247_s4 = inlined_call_operand.vmem [shape: f32[1,128], index: 4, kind: input, shape index: {}]   ;;  %s1248_s5 = inlined_call_operand.hbm [shape: bf16[16,128], index: 5, kind: output, shape index: {}]  }
   0x1   :  { %11 = vsyncpa [#allocation6], 0 }
   0x2   :  { %12 = vsyncpa [#allocation4], 0  ;;  %s1127_s18 = smov [#allocation5]   ;;  %s1033_s22 = scalar_lea.hbm %s1244_s1, 6272 }
   0x3   :  { %s30_s19 = sshll.u32 %s1127_s18, 4  ;;  %p1034_p0 = scmp.ne.s32.totalorder %s1244_s1, %s1033_s22  ;;  %s31_s19 = int_to_ptr.vmem [resolvable:$true] %s30_s19 }
   0x4   :  { %p1037_p1 = scmp.lt.u32.totalorder %s1033_s22, %s1244_s1 }
   0x6   :  { %p1039_p2 = pnand %p1037_p1, %p1034_p0 }
   0x8   :  { %1042 = shalt.err (!%p1039_p2)
}
   0x9   :  { %s1043_s27 = scalar_lea.vmem %s31_s19, 6272  ;;  %p1048_p4 = scmp.lt.s32.totalorder %s31_s19, %s31_s19 }
   0xa   :  { %p1044_p3 = scmp.ne.s32.totalorder %s31_s19, %s1043_s27  ;;  %p1049_p5 = scmp.lt.s32.totalorder %s1043_s27, %s1043_s27 }
   0xc   :  { %p1050_p6 = por %p1049_p5, %p1048_p4 }
   0xe   :  { %p1051_p7 = pnand %p1050_p6, %p1044_p3 }
  0x10   :  { %1054 = shalt.err (!%p1051_p7)
}
  0x11   :  { %s1128_s28 = smov 64   ;;  %s1129_s29 = smov 4  }
  0x12   :  { %36 = dma.hbm_to_vmem [thread:$0]  %s1244_s1, 6272, %s31_s19, [#allocation6], %s1128_s28, %s1128_s28, %s1129_s29  }
  0x13   :  { %s1130_s7 = smov [#allocation2]   ;;  %s1055_s11 = scalar_lea.hbm %s1243_s0, 1792 }
  0x14   :  { %s18_s8 = sshll.u32 %s1130_s7, 4  ;;  %p1056_p8 = scmp.ne.s32.totalorder %s1243_s0, %s1055_s11  ;;  %s19_s8 = int_to_ptr.vmem [resolvable:$true] %s18_s8 }
  0x15   :  { %p1059_p9 = scmp.lt.u32.totalorder %s1055_s11, %s1243_s0 }
  0x17   :  { %p1061_p10 = pnand %p1059_p9, %p1056_p8 }
  0x19   :  { %1064 = shalt.err (!%p1061_p10)
}
  0x1a   :  { %s1065_s16 = scalar_lea.vmem %s19_s8, 1792  ;;  %p1070_p12 = scmp.lt.s32.totalorder %s19_s8, %s19_s8 }
  0x1b   :  { %p1066_p11 = scmp.ne.s32.totalorder %s19_s8, %s1065_s16  ;;  %p1071_p13 = scmp.lt.s32.totalorder %s1065_s16, %s1065_s16 }
  0x1d   :  { %p1072_p0 = por %p1071_p13, %p1070_p12 }
  0x1f   :  { %p1073_p1 = pnand %p1072_p0, %p1066_p11 }
  0x21   :  { %1076 = shalt.err (!%p1073_p1)
}
  0x22   :  { %s1131_s1 = smov 896   ;;  %s1132_s17 = smov 56  }
  0x23   :  { %24 = dma.hbm_to_vmem [thread:$0]  %s1243_s0, 1792, %s19_s8, [#allocation3], %s1131_s1, %s1131_s1, %s1132_s17  }
  0x24   :  { %s1133_s20 = smov [#allocation7]   ;;  %s1077_s24 = scalar_lea.hbm %s1246_s3, 1024 }
  0x25   :  { %s44_s21 = sshll.u32 %s1133_s20, 4  ;;  %p1078_p2 = scmp.ne.s32.totalorder %s1246_s3, %s1077_s24  ;;  %s45_s21 = int_to_ptr.vmem [resolvable:$true] %s44_s21 }
  0x26   :  { %p1081_p3 = scmp.lt.u32.totalorder %s1077_s24, %s1246_s3 }
  0x28   :  { %p1083_p4 = pnand %p1081_p3, %p1078_p2 }
  0x2a   :  { %1086 = shalt.err (!%p1083_p4)
}
  0x2b   :  { %s1087_s6 = scalar_lea.vmem %s45_s21, 1024  ;;  %p1092_p6 = scmp.lt.s32.totalorder %s45_s21, %s45_s21 }
  0x2c   :  { %p1088_p5 = scmp.ne.s32.totalorder %s45_s21, %s1087_s6  ;;  %p1093_p7 = scmp.lt.s32.totalorder %s1087_s6, %s1087_s6 }
  0x2e   :  { %p1094_p8 = por %p1093_p7, %p1092_p6 }
  0x30   :  { %p1095_p9 = pnand %p1094_p8, %p1088_p5 }
  0x32   :  { %1098 = shalt.err (!%p1095_p9)
}
  0x33   :  { %50 = dma.hbm_to_vmem [thread:$0]  %s1246_s3, 1024, %s45_s21, [#allocation6], %s1128_s28, %s1128_s28, %s1129_s29  }
  0x34   :  { %1121 = dma.done.wait [#allocation3], 1792  }
  0x35   :  { %1122 = vsyncadd [#allocation3], 4294965504 }
  0x36   :  { %1123 = dma.done.wait [#allocation6], 7296  }
  0x37   :  { %1124 = vsyncadd [#allocation6], 4294960000  ;;  %v976_v0 = vld [vmem:[#allocation5 + $0x40] sm:$0xff]   ;;  %v980_v4 = vld [vmem:[#allocation5 + $0x48] sm:$0xff]   ;;  %v1134_v43 = vmov 0.0   ;;  %vm1135_vm0 = vmmov 0  }
  0x38   :  { %v977_v1 = vld [vmem:[#allocation5] sm:$0xff]   ;;  %863 = vmatprep.subr.bf16.mxu0 %v976_v0  ;;  %v981_v5 = vld [vmem:[#allocation5 + $0x8] sm:$0xff]   ;;  %v984_v8 = vld [vmem:[#allocation5 + $0x50] sm:$0xff]   ;;  %vm483_vm1 = vcmask 130048   ;;  %s1136_s10 = smov [#allocation8]  }
  0x39   :  { %v978_v2 = vld [vmem:[#allocation5 + $0xc0] sm:$0xff]   ;;  %864 = vmatpush3.bf16.msra.mxu0 %v977_v1  ;;  %v982_v6 = vld [vmem:[#allocation5 + $0xc8] sm:$0xff]   ;;  %v985_v9 = vld [vmem:[#allocation5 + $0x10] sm:$0xff]   ;;  %s781_s11 = sshll.u32 %s1136_s10, 4  ;;  %s782_s11 = int_to_ptr.vmem [resolvable:$true] %s781_s11 }
  0x3a   :  { %v979_v3 = vld [vmem:[#allocation5 + $0x80] sm:$0xff]   ;;  %885 = vmatprep.subr.bf16.mxu1 %v978_v2  ;;  %865 = vmatprep.subr.bf16.mxu0 %v980_v4  ;;  %v983_v7 = vld [vmem:[#allocation5 + $0x88] sm:$0xff]   ;;  %v986_v10 = vld [vmem:[#allocation5 + $0xd0] sm:$0xff]   ;;  %s1099_s12 = scalar_lea.vmem %s782_s11, 128  ;;  %p1104_p11 = scmp.lt.s32.totalorder %s782_s11, %s782_s11 }
  0x3b   :  { %886 = vmatpush3.bf16.msra.mxu1 %v979_v3  ;;  %v987_v11 = vld [vmem:[#allocation5 + $0x90] sm:$0xff]   ;;  %v988_v12 = vld [vmem:[#allocation5 + $0x58] sm:$0xff]   ;;  %v992_v16 = vld [vmem:[#allocation5 + $0x60] sm:$0xff]   ;;  %p1100_p10 = scmp.ne.s32.totalorder %s782_s11, %s1099_s12  ;;  %p1105_p12 = scmp.lt.s32.totalorder %s1099_s12, %s1099_s12 }
  0x3c   :  { %887 = vmatprep.subr.bf16.mxu1 %v982_v6  ;;  %v989_v13 = vld [vmem:[#allocation5 + $0x18] sm:$0xff]   ;;  %v993_v17 = vld [vmem:[#allocation5 + $0x20] sm:$0xff]   ;;  %v996_v20 = vld [vmem:[#allocation5 + $0x68] sm:$0xff]  }
  0x3d   :  { %866 = vmatpush3.bf16.msra.mxu0 %v981_v5  ;;  %v990_v14 = vld [vmem:[#allocation5 + $0xd8] sm:$0xff]   ;;  %v994_v18 = vld [vmem:[#allocation5 + $0xe0] sm:$0xff]   ;;  %v997_v21 = vld [vmem:[#allocation5 + $0x28] sm:$0xff]   ;;  %p1106_p13 = por %p1105_p12, %p1104_p11 }
  0x3e   :  { %867 = vmatprep.subr.bf16.mxu0 %v984_v8  ;;  %v991_v15 = vld [vmem:[#allocation5 + $0x98] sm:$0xff]   ;;  %v995_v19 = vld [vmem:[#allocation5 + $0xa0] sm:$0xff]   ;;  %v998_v22 = vld [vmem:[#allocation5 + $0xe8] sm:$0xff]  }
  0x3f   :  { %888 = vmatpush3.bf16.msra.mxu1 %v983_v7  ;;  %v999_v23 = vld [vmem:[#allocation5 + $0xa8] sm:$0xff]   ;;  %v1000_v24 = vld [vmem:[#allocation5 + $0x70] sm:$0xff]   ;;  %v1004_v28 = vld [vmem:[#allocation5 + $0x78] sm:$0xff]   ;;  %p1107_p0 = pnand %p1106_p13, %p1100_p10 }
  0x40   :  { %889 = vmatprep.subr.bf16.mxu1 %v986_v10  ;;  %v1001_v25 = vld [vmem:[#allocation5 + $0x30] sm:$0xff]   ;;  %v1005_v29 = vld [vmem:[#allocation5 + $0x38] sm:$0xff]   ;;  %v70_v36 = vld [vmem:[#allocation2 + $0x38] sm:$0xff] }
  0x41   :  { %868 = vmatpush3.bf16.msra.mxu0 %v985_v9  ;;  %v1002_v26 = vld [vmem:[#allocation5 + $0xf0] sm:$0xff]   ;;  %v1006_v30 = vld [vmem:[#allocation5 + $0xf8] sm:$0xff]   ;;  %v1008_v38 = vld [vmem:[#allocation5 + $0x140] sm:$0xff]  }
  0x42   :  { %869 = vmatprep.subr.bf16.mxu0 %v988_v12  ;;  %v1003_v27 = vld [vmem:[#allocation5 + $0xb0] sm:$0xff]   ;;  %v64_v31 = vld [vmem:[#allocation2 + $0x8] sm:$0xff]  ;;  %v66_v39 = vld [vmem:[#allocation2 + $0x18] sm:$0xff] }
  0x43   :  { %890 = vmatpush3.bf16.msra.mxu1 %v987_v11  ;;  %v71_v32 = vld [vmem:[#allocation2 + $0x40] sm:$0xff]  ;;  %v1007_v34 = vld [vmem:[#allocation5 + $0xb8] sm:$0xff]   ;;  %v73_v40 = vld [vmem:[#allocation2 + $0x50] sm:$0xff] }
  0x44   :  { %891 = vmatprep.subr.bf16.mxu1 %v990_v14  ;;  %v78_v33 = vpack.c.bf16 %v71_v32, %v64_v31  ;;  %v63_v35 = vld [vmem:[#allocation2] sm:$0xff]  ;;  %v80_v41 = vpack.c.bf16 %v73_v40, %v66_v39  ;;  %v1009_v42 = vld [vmem:[#allocation5 + $0x100] sm:$0xff]   ;;  %v72_v45 = vld [vmem:[#allocation2 + $0x48] sm:$0xff] }
  0x45   :  { %870 = vmatpush3.bf16.msra.mxu0 %v989_v13  ;;  %v77_v37 = vpack.c.bf16 %v70_v36, %v63_v35  ;;  %v65_v44 = vld [vmem:[#allocation2 + $0x10] sm:$0xff]  ;;  %v1010_v47 = vld [vmem:[#allocation5 + $0x148] sm:$0xff]   ;;  %v1012_v49 = vld [vmem:[#allocation5 + $0x150] sm:$0xff]  }
  0x46   :  { %871 = vmatprep.subr.bf16.mxu0 %v992_v16  ;;  %519 = vmatprep.mubr.bf16.mxu0 %v78_v33  ;;  %v79_v46 = vpack.c.bf16 %v72_v45, %v65_v44  ;;  %v1011_v48 = vld [vmem:[#allocation5 + $0x108] sm:$0xff]   ;;  %v1013_v50 = vld [vmem:[#allocation5 + $0x110] sm:$0xff]   ;;  %v1014_v51 = vld [vmem:[#allocation5 + $0x158] sm:$0xff]  }
  0x47   :  { %892 = vmatpush3.bf16.msra.mxu1 %v991_v15  ;;  %560 = vmatprep.mubr.bf16.mxu1 %v80_v41  ;;  %v1015_v52 = vld [vmem:[#allocation5 + $0x118] sm:$0xff]   ;;  %v1016_v53 = vld [vmem:[#allocation5 + $0x160] sm:$0xff]   ;;  %v1018_v55 = vld [vmem:[#allocation5 + $0x168] sm:$0xff]  }
  0x48   :  { %893 = vmatprep.subr.bf16.mxu1 %v994_v18  ;;  %v1017_v54 = vld [vmem:[#allocation5 + $0x120] sm:$0xff]   ;;  %v68_v57 = vld [vmem:[#allocation2 + $0x28] sm:$0xff]  ;;  %v1019_v58 = vld [vmem:[#allocation5 + $0x128] sm:$0xff]  }
  0x49   :  { %872 = vmatpush3.bf16.msra.mxu0 %v993_v17  ;;  %v1024_v56 = vld [vmem:[#allocation5 + $0x180] sm:$0xff]   ;;  %v1020_v59 = vld [vmem:[#allocation5 + $0x170] sm:$0xff]   ;;  %v76_v63 = vld [vmem:[#allocation2 + $0x68] sm:$0xff] }
  0x4a   :  { %873 = vmatprep.subr.bf16.mxu0 %v996_v20  ;;  %v75_v60 = vld [vmem:[#allocation2 + $0x60] sm:$0xff]  ;;  %v69_v62 = vld [vmem:[#allocation2 + $0x30] sm:$0xff]  ;;  %v1022_v2 = vld [vmem:[#allocation5 + $0x178] sm:$0xff]  }
  0x4b   :  { %894 = vmatpush3.bf16.msra.mxu1 %v995_v19  ;;  %v82_v61 = vpack.c.bf16 %v75_v60, %v68_v57  ;;  %v83_v0 = vpack.c.bf16 %v76_v63, %v69_v62  ;;  %v1021_v1 = vld [vmem:[#allocation5 + $0x130] sm:$0xff]   ;;  %v1023_v3 = vld [vmem:[#allocation5 + $0x138] sm:$0xff]   ;;  %v74_v5 = vld [vmem:[#allocation2 + $0x58] sm:$0xff] }
  0x4c   :  { %895 = vmatprep.subr.bf16.mxu1 %v998_v22  ;;  %v67_v4 = vld [vmem:[#allocation2 + $0x20] sm:$0xff]  ;;  %v1025_v7 = vld [vmem:[#allocation7] sm:$0xff]   ;;  %v1027_v9 = vld [vmem:[#allocation7 + $0x10] sm:$0xff]  }
  0x4d   :  { %874 = vmatpush3.bf16.msra.mxu0 %v997_v21  ;;  %v81_v6 = vpack.c.bf16 %v74_v5, %v67_v4  ;;  %v1026_v8 = vld [vmem:[#allocation7 + $0x8] sm:$0xff]   ;;  %v1028_v10 = vld [vmem:[#allocation7 + $0x18] sm:$0xff]   ;;  %v1029_v11 = vld [vmem:[#allocation7 + $0x20] sm:$0xff]  }
  0x4e   :  { %875 = vmatprep.subr.bf16.mxu0 %v1000_v24  ;;  %v1030_v12 = vld [vmem:[#allocation7 + $0x28] sm:$0xff]   ;;  %v1031_v13 = vld [vmem:[#allocation7 + $0x30] sm:$0xff]   ;;  %v1032_v14 = vld [vmem:[#allocation7 + $0x38] sm:$0xff]  }
  0x4f   :  { %896 = vmatpush3.bf16.msra.mxu1 %v999_v23  ;;  %v794_v16 = vld [vmem:[%s1245_s2] ss:$0 sm:$0xff] }
  0x50   :  { %897 = vmatprep.subr.bf16.mxu1 %v1002_v26 }
  0x51   :  { %876 = vmatpush3.bf16.msra.mxu0 %v1001_v25 }
  0x52   :  { %877 = vmatprep.subr.bf16.mxu0 %v1004_v28 }
  0x53   :  { %898 = vmatpush3.bf16.msra.mxu1 %v1003_v27 }
  0x54   :  { %899 = vmatprep.subr.bf16.mxu1 %v1006_v30 }
  0x55   :  { %878 = vmatpush3.bf16.msra.mxu0 %v1005_v29 }
  0x56   :  { %907 = vmatprep.subr.bf16.mxu0 %v1008_v38 }
  0x57   :  { %900 = vmatpush3.bf16.msra.mxu1 %v1007_v34 }
  0x58   :  { %940 = vmatprep.subr.bf16.mxu1 %v1134_v43  ;;  %520 = vmatmul.mubr.bf16.vlgmr.msra.gmra.mrb[0].mxu0 %v77_v37 }
  0x59   :  { %908 = vmatpush3.bf16.msra.mxu0 %v1009_v42  ;;  %601 = vmatprep.mubr.bf16.mxu0 %v82_v61 }
  0x5a   :  { %561 = vmatmul.mubr.bf16.vlgmr.msra.gmra.mrb[0].mxu1 %v79_v46  ;;  %909 = vmatprep.subr.bf16.mxu0 %v1010_v47 }
  0x5b   :  { %942 = vmatprep.mubr.msk.bf16.mxu1 %vm1135_vm0, %v1134_v43  ;;  %941 = vmatpush3.bf16.msra.mxu1 %v1024_v56 }
  0x5c   :  { %946 = vmatprep.subr.bf16.mxu1 %v1134_v43 }
  0x5d   :  { %910 = vmatpush3.bf16.msra.mxu0 %v1011_v48 }
  0x5e   :  { %911 = vmatprep.subr.bf16.mxu0 %v1012_v49  ;;  %v845_v49 = vld [vmem:[%s1247_s4] ss:$0 sm:$0xff] }
  0x61   :  { %912 = vmatpush3.bf16.msra.mxu0 %v1013_v50 }
  0x62   :  { %913 = vmatprep.subr.bf16.mxu0 %v1014_v51  ;;  %943 = vmatmul.mubr.msk.bf16.vlgmr.msra.gmra.mrb[4].mxu1 %vm483_vm1, %v83_v0 }
  0x63   :  { %962 = vmatprep.mubr.msk.bf16.mxu1 %vm1135_vm0, %v1134_v43  ;;  %947 = vmatpush3.bf16.msra.mxu1 %v1025_v7 }
  0x64   :  { %948 = vmatprep.subr.bf16.mxu1 %v1134_v43 }
  0x65   :  { %914 = vmatpush3.bf16.msra.mxu0 %v1015_v52 }
  0x66   :  { %915 = vmatprep.subr.bf16.mxu0 %v1016_v53 }
  0x67   :  { %949 = vmatpush3.bf16.msra.mxu1 %v1026_v8 }
  0x68   :  { %950 = vmatprep.subr.bf16.mxu1 %v1134_v43 }
  0x69   :  { %916 = vmatpush3.bf16.msra.mxu0 %v1017_v54 }
  0x6a   :  { %917 = vmatprep.subr.bf16.mxu0 %v1018_v55 }
  0x6b   :  { %951 = vmatpush3.bf16.msra.mxu1 %v1027_v9 }
  0x6c   :  { %952 = vmatprep.subr.bf16.mxu1 %v1134_v43 }
  0x6d   :  { %918 = vmatpush3.bf16.msra.mxu0 %v1019_v58 }
  0x6e   :  { %919 = vmatprep.subr.bf16.mxu0 %v1020_v59 }
  0x6f   :  { %953 = vmatpush3.bf16.msra.mxu1 %v1028_v10 }
  0x70   :  { %954 = vmatprep.subr.bf16.mxu1 %v1134_v43 }
  0x71   :  { %920 = vmatpush3.bf16.msra.mxu0 %v1021_v1 }
  0x72   :  { %921 = vmatprep.subr.bf16.mxu0 %v1022_v2 }
  0x73   :  { %955 = vmatpush3.bf16.msra.mxu1 %v1029_v11 }
  0x74   :  { %956 = vmatprep.subr.bf16.mxu1 %v1134_v43 }
  0x75   :  { %922 = vmatpush3.bf16.msra.mxu0 %v1023_v3 }
  0x77   :  { %957 = vmatpush3.bf16.msra.mxu1 %v1030_v12 }
  0x78   :  { %602 = vmatmul.mubr.bf16.vlgmr.msra.gmra.mrb[4].mxu0 %v81_v6  ;;  %958 = vmatprep.subr.bf16.mxu1 %v1134_v43 }
  0x7b   :  { %959 = vmatpush3.bf16.msra.mxu1 %v1031_v13 }
  0x7c   :  { %960 = vmatprep.subr.bf16.mxu1 %v1134_v43 }
  0x7f   :  { %961 = vmatpush3.bf16.msra.mxu1 %v1032_v14 }
 0x12b   :  { %v879_v15 = vpop.f32.mrb[0].mxu0 }
 0x12c   :  { %v880_v17 = vpop.f32.mrb[1].mxu0 }
 0x12d   :  { %v881_v18 = vadd.f32 %v880_v17, %v879_v15  ;;  %v882_v19 = vpop.f32.mrb[2].mxu0  ;;  %v901_v20 = vpop.f32.mrb[0].mxu1 }
 0x12e   :  { %v883_v21 = vpop.f32.mrb[3].mxu0  ;;  %v902_v24 = vpop.f32.mrb[1].mxu1 }
 0x12f   :  { %v522_v22 = vadd.f32 %v881_v18, %v794_v16  ;;  %v884_v23 = vadd.f32 %v883_v21, %v882_v19  ;;  %v903_v25 = vadd.f32 %v902_v24, %v901_v20  ;;  %v904_v26 = vpop.f32.mrb[2].mxu1 }
 0x130   :  { %v905_v28 = vpop.f32.mrb[3].mxu1 }
 0x131   :  { %v525_v27 = vadd.f32 %v884_v23, %v794_v16  ;;  %v563_v29 = vadd.f32 %v903_v25, %v522_v22  ;;  %v906_v30 = vadd.f32 %v905_v28, %v904_v26 }
 0x133   :  { %v566_v31 = vadd.f32 %v906_v30, %v525_v27 }
 0x135   :  { %v644_v32 = vpop.f32.mrb[4].mxu1 }
 0x136   :  { %v944_v33 = vpop.f32.mrb[5].mxu1 }
 0x137   :  { %v647_v34 = vpop.f32.mrb[6].mxu1 }
 0x138   :  { %v945_v35 = vpop.f32.mrb[7].mxu1 }
 0x14b   :  { %v923_v36 = vpop.f32.mrb[4].mxu0 }
 0x14c   :  { %v924_v37 = vpop.f32.mrb[5].mxu0 }
 0x14d   :  { %v925_v38 = vadd.f32 %v924_v37, %v923_v36  ;;  %v926_v39 = vpop.f32.mrb[6].mxu0 }
 0x14e   :  { %v927_v40 = vpop.f32.mrb[7].mxu0 }
 0x14f   :  { %v604_v41 = vadd.f32 %v925_v38, %v563_v29  ;;  %v928_v42 = vadd.f32 %v927_v40, %v926_v39 }
 0x151   :  { %v645_v43 = vadd.f32 %v644_v32, %v604_v41  ;;  %v607_v44 = vadd.f32 %v928_v42, %v566_v31 }
 0x153   :  { %v648_v45 = vadd.f32 %v647_v34, %v607_v44  ;;  %v651_v46 = vmax.f32 %v645_v43, 0.0 }
 0x155   :  { %v652_v47 = vmax.f32 %v648_v45, 0.0 }
 0x157   :  { %v653_v48 = vpack.c.bf16 %v652_v47, %v651_v46 }
 0x159   :  { %963 = vmatmul.mubr.bf16.vlgmr.msra.gmra.mrb[8].mxu1 %v653_v48 }
 0x22c   :  { %v759_v50 = vpop.f32.mrb[8].mxu1 }
 0x22d   :  { %v964_v51 = vpop.f32.mrb[9].mxu1  ;;  %v760_v53 = vadd.f32 %v845_v49, %v759_v50 }
 0x22e   :  { %v762_v52 = vpop.f32.mrb[10].mxu1 }
 0x22f   :  { %v763_v54 = vadd.f32 %v845_v49, %v762_v52  ;;  %v965_v55 = vpop.f32.mrb[11].mxu1 }
 0x231   :  { %v861_v56 = vpack.c.bf16 %v763_v54, %v760_v53 }
 0x233   :  { %862 = vst [vmem:[#allocation8] sm:$0xff] %v861_v56  }
 0x234   :  { %1110 = shalt.err (!%p1107_p0)
}
 0x235   :  { %s1111_s14 = scalar_lea.hbm %s1248_s5, 128 }
 0x236   :  { %p1112_p1 = scmp.ne.s32.totalorder %s1248_s5, %s1111_s14  ;;  %p1115_p2 = scmp.lt.u32.totalorder %s1111_s14, %s1248_s5 }
 0x238   :  { %p1117_p3 = pnand %p1115_p2, %p1112_p1 }
 0x23a   :  { %1120 = shalt.err (!%p1117_p3)
}
 0x23b   :  { %787 = dma.vmem_to_hbm [thread:$0]  %s782_s11, 128, %s1248_s5, [#allocation4], %s1128_s28, %s1128_s28, %s1129_s29  }
 0x23c   :  { %1125 = dma.done.wait [#allocation4], 128  }
 0x23d   :  { %1126 = vsyncadd [#allocation4], 4294967168 }
 0x23e   :  { %791 = vsyncpa [#allocation3], 1 }
 0x23f   :  { %792 = vsyncpa [#allocation6], 1 }
 0x240   :  { %793 = vsyncpa [#allocation4], 1 }

</bundles_post_ra>
